<compile_context>
chip_gen: v5e
topology: v5e:2x2
jax: 0.10.0
libtpu: 0.0.40
codegen_flags: <defaults>
</compile_context>

<pallas_src>
from functools import partial

import jax
import jax.numpy as jnp
from jax import lax
from jax.experimental import pallas as pl
from jax.experimental.pallas import tpu as pltpu

_LANE = 128


def _round_up(n, m):
    return ((n + m - 1) // m) * m


def rnn_classify_kernel(tok_ref, eproj_ref, whh_ref, wc_ref, bc_ref,
                        logits_ref, preds_ref, *, seq_len, batch):
    # tok_ref:   (B*S, 1) int32   tokens, row index = b*S + t (batch-major flatten)
    # eproj_ref: (V_pad, H) f32   emb @ W_ih^T + (b_ih + b_hh), rows >= V are zero
    # whh_ref:   (H, H)   bf16    W_hh^T
    # wc_ref:    (H, C)   f32     W_cls^T * (1/seq_len)   (mean folded in)
    # bc_ref:    (1, C)   f32     b_cls
    # logits_ref:(B, C)   f32     mean-over-time logits
    # preds_ref: (B, 1)   int32   argmax over classes
    v_pad, h_dim = eproj_ref.shape
    num_classes = wc_ref.shape[1]
    rows = batch * seq_len

    # ---- fused embedding gather + (pre-folded) input projection, off the recurrence ----
    tok = tok_ref[...]                                                     # (B*S, 1) i32
    onehot = (lax.broadcasted_iota(jnp.int32, (rows, v_pad), 1) == tok
              ).astype(jnp.float32)                                        # exact 0/1
    x_all = jnp.dot(onehot, eproj_ref[...], preferred_element_type=jnp.float32)
    x_all = x_all.reshape(batch, seq_len, h_dim)                           # tile-aligned

    # ---- recurrence: W_hh loaded once, loop fully unrolled (seq_len static) ----
    # bf16 on the matmul operands only; add/tanh/acc stay f32 (v5e-safe, f32 accumulate).
    # TODO(synk): a weight-stationary pltpu.matmul_push_rhs/acc_lhs/pop sequence could hold
    # W_hh in the MXU across the unrolled steps; kept on jnp.dot for portable lowering.
    whh = whh_ref[...]                                                     # (H, H) bf16
    h = jnp.zeros((batch, h_dim), jnp.float32)
    acc = jnp.zeros((batch, h_dim), jnp.float32)
    for t in range(seq_len):
        x_t = x_all[:, t, :]                                               # static slice
        hh = jnp.dot(h.astype(jnp.bfloat16), whh, preferred_element_type=jnp.float32)
        h = jnp.tanh(x_t + hh)
        acc = acc + h

    # ---- classifier (mean already folded into wc) + in-kernel argmax epilogue ----
    logits = jnp.dot(acc, wc_ref[...], preferred_element_type=jnp.float32) + bc_ref[...]
    logits_ref[...] = logits
    m = jnp.max(logits, axis=1, keepdims=True)
    lane = lax.broadcasted_iota(jnp.int32, logits.shape, 1).astype(jnp.float32)
    idx = jnp.min(jnp.where(logits == m, lane, jnp.float32(num_classes)),
                  axis=1, keepdims=True)                                   # first max index
    preds_ref[...] = idx.astype(jnp.int32)


def prepare_params(params, sentence_length):
    """One-time weight prep (projection hoist + transposes + mean folding)."""
    emb = params["embedding"].astype(jnp.float32)            # (V, D)
    v, _ = emb.shape
    h = params["w_hh"].shape[0]
    c = params["w_cls"].shape[0]
    v_pad = _round_up(v, _LANE)
    bias = (params["b_ih"] + params["b_hh"]).reshape(1, h)
    # Hoisted input projection with the RNN bias folded into every real row.
    eproj_real = emb @ jnp.transpose(params["w_ih"]) + bias   # (V, H)
    eproj_b = jnp.zeros((v_pad, h), jnp.float32).at[:v].set(eproj_real)
    return {
        "eproj_b": eproj_b,                                               # (V_pad, H) f32
        "whh_bf16": jnp.transpose(params["w_hh"]).astype(jnp.bfloat16),   # (H, H) bf16
        "wc_scaled": (jnp.transpose(params["w_cls"])
                      * (1.0 / sentence_length)).astype(jnp.float32),     # (H, C) f32
        "bc": params["b_cls"].reshape(1, c).astype(jnp.float32),          # (1, C) f32
        "sentence_length": int(sentence_length),
        "num_classes": int(c),
    }


@partial(jax.jit, static_argnames=("sentence_length",))
def _forward_jit(x_tokens, eproj_b, whh_bf16, wc_scaled, bc, *, sentence_length):
    bsz, seq = x_tokens.shape
    if seq != sentence_length:
        raise ValueError("sequence length must equal sentence_length (module invariant)")
    num_classes = wc_scaled.shape[1]

    # Only wrapper glue: a free contiguous reshape of the tiny int32 token array.
    tok_col = x_tokens.astype(jnp.int32).reshape(bsz * seq, 1)

    kernel = partial(rnn_classify_kernel, seq_len=seq, batch=bsz)
    logits, preds = pl.pallas_call(
        kernel,
        out_shape=(jax.ShapeDtypeStruct((bsz, num_classes), jnp.float32),
                   jax.ShapeDtypeStruct((bsz, 1), jnp.int32)),
        in_specs=[pl.BlockSpec(memory_space=pltpu.MemorySpace.VMEM)] * 5,
        out_specs=(pl.BlockSpec(memory_space=pltpu.MemorySpace.VMEM),
                   pl.BlockSpec(memory_space=pltpu.MemorySpace.VMEM)),
    )(tok_col, eproj_b, whh_bf16, wc_scaled, bc)

    return preds[:, 0], logits


def torch_model_forward(x_tokens, prepared):
    """Returns (argmax predictions (B,), mean logits (B, C))."""
    return _forward_jit(
        x_tokens,
        prepared["eproj_b"], prepared["whh_bf16"], prepared["wc_scaled"], prepared["bc"],
        sentence_length=prepared["sentence_length"],
    )


def reference_forward(x_tokens, params):
    """Pure-JAX f32 reference mirroring the PyTorch graph step by step."""
    x_emb = jnp.take(params["embedding"], x_tokens, axis=0)
    bsz, seq, _ = x_emb.shape
    h_dim = params["w_hh"].shape[0]
    h = jnp.zeros((bsz, h_dim), jnp.float32)
    per_step = []
    for t in range(seq):
        h = jnp.tanh(x_emb[:, t, :] @ params["w_ih"].T + params["b_ih"]
                     + h @ params["w_hh"].T + params["b_hh"])
        per_step.append(h @ params["w_cls"].T + params["b_cls"])
    y_pred = jnp.mean(jnp.stack(per_step, axis=1), axis=1)
    return jnp.argmax(y_pred, axis=1), y_pred


def make_params(key, vocab_size, vector_dim, sentence_length, hidden=128):
    ks = jax.random.split(key, 7)
    scale = 0.1
    emb = scale * jax.random.normal(ks[0], (vocab_size, vector_dim), jnp.float32)
    emb = emb.at[0].set(0.0)  # nn.Embedding(padding_idx=0) zeroes row 0 at init
    return {
        "embedding": emb,
        "w_ih": scale * jax.random.normal(ks[1], (hidden, vector_dim), jnp.float32),
        "w_hh": scale * jax.random.normal(ks[2], (hidden, hidden), jnp.float32),
        "b_ih": scale * jax.random.normal(ks[3], (hidden,), jnp.float32),
        "b_hh": scale * jax.random.normal(ks[4], (hidden,), jnp.float32),
        "w_cls": scale * jax.random.normal(ks[5], (sentence_length, hidden), jnp.float32),
        "b_cls": scale * jax.random.normal(ks[6], (sentence_length,), jnp.float32),
    }


if __name__ == "__main__":
    # Small shapes consistent with the module:
    #   vocab size 30, vector_dim 32, sentence_length 8 (seq len == num classes), batch 2
    VOCAB, D, S, B, H = 30, 32, 8, 2, 128
    ATOL = 2e-2  # bf16 recurrence operands -> loosened vs an all-f32 reference

    key = jax.random.PRNGKey(0)
    k_param, k_tok = jax.random.split(key)
    params = make_params(k_param, VOCAB, D, S, H)
    x_tokens = jax.random.randint(k_tok, (B, S), 0, VOCAB, dtype=jnp.int32)

    prepared = prepare_params(params, sentence_length=S)
    preds, logits = torch_model_forward(x_tokens, prepared)
    preds = jax.block_until_ready(preds)
    logits = jax.block_until_ready(logits)

    ref_preds, ref_logits = reference_forward(x_tokens, params)

    # 1) Logits match the f32 reference to bf16-recurrence tolerance.
    assert jnp.allclose(logits, ref_logits, atol=ATOL), "logits mismatch vs reference"
    # 2) The in-kernel argmax is exactly consistent with XLA argmax on the same logits.
    assert bool(jnp.all(preds == jnp.argmax(logits, axis=1))), "in-kernel argmax wrong"
    # 3) Predictions match the reference wherever the reference top-2 margin exceeds
    #    the numerical tolerance (margin-aware check so bf16 rounding cannot flake it).
    ref_sorted = jnp.sort(ref_logits, axis=1)
    margin = ref_sorted[:, -1] - ref_sorted[:, -2]
    assert bool(jnp.all((preds == ref_preds) | (margin < 2 * ATOL))), \
        "argmax mismatch beyond numerical margin"

    print("KERNEL_OK")
</pallas_src>

<mosaic_0001>
module attributes {stable_mosaic.version = 11 : i64} {
  func.func @rnn_classify_kernel(%arg0: memref<16x1xi32, #tpu.memory_space<vmem>>, %arg1: memref<128x128xf32, #tpu.memory_space<vmem>>, %arg2: memref<128x128xbf16, #tpu.memory_space<vmem>>, %arg3: memref<128x8xf32, #tpu.memory_space<vmem>>, %arg4: memref<1x8xf32, #tpu.memory_space<vmem>>, %arg5: memref<2x8xf32, #tpu.memory_space<vmem>>, %arg6: memref<2x1xi32, #tpu.memory_space<vmem>>) attributes {dimension_semantics = [], scalar_prefetch = 0 : i64, scratch_operands = 0 : i64, tpu.core_type = #tpu.core_type<tc>} {
    %c0 = arith.constant 0 : index
    %c0_0 = arith.constant 0 : index
    %0 = vector.load %arg0[%c0, %c0_0] : memref<16x1xi32, #tpu.memory_space<vmem>>, vector<16x1xi32>
    %1 = tpu.iota {dimensions = array<i32: 1>} : vector<16x128xi32>
    %2 = vector.broadcast %0 : vector<16x1xi32> to vector<16x128xi32>
    %3 = arith.cmpi eq, %1, %2 : vector<16x128xi32>
    %4 = arith.extui %3 : vector<16x128xi1> to vector<16x128xi32>
    %5 = arith.sitofp %4 : vector<16x128xi32> to vector<16x128xf32>
    %c0_1 = arith.constant 0 : index
    %c0_2 = arith.constant 0 : index
    %6 = vector.load %arg1[%c0_1, %c0_2] : memref<128x128xf32, #tpu.memory_space<vmem>>, vector<128x128xf32>
    %cst = arith.constant dense<0.000000e+00> : vector<16x128xf32>
    %7 = tpu.matmul %5, %6, %cst {dimension_numbers = #tpu.dot_dimension_numbers<[1], [0], [0], [1], [0, 0, 1, 1], [], []>} : vector<16x128xf32>, vector<128x128xf32>, vector<16x128xf32> -> vector<16x128xf32>
    %8 = vector.shape_cast %7 : vector<16x128xf32> to vector<2x8x128xf32>
    %c0_3 = arith.constant 0 : index
    %c0_4 = arith.constant 0 : index
    %9 = vector.load %arg2[%c0_3, %c0_4] : memref<128x128xbf16, #tpu.memory_space<vmem>>, vector<128x128xbf16>
    %cst_5 = arith.constant 0.000000e+00 : f32
    %10 = vector.broadcast %cst_5 : f32 to vector<2x128xf32>
    %cst_6 = arith.constant 0.000000e+00 : f32
    %11 = vector.broadcast %cst_6 : f32 to vector<2x128xf32>
    %12 = vector.extract_strided_slice %8 {offsets = [0, 0, 0], sizes = [2, 1, 128], strides = [1, 1, 1]} : vector<2x8x128xf32> to vector<2x1x128xf32>
    %13 = vector.shape_cast %12 : vector<2x1x128xf32> to vector<2x128xf32>
    %14 = arith.truncf %10 : vector<2x128xf32> to vector<2x128xbf16>
    %cst_7 = arith.constant dense<0.000000e+00> : vector<2x128xf32>
    %15 = tpu.matmul %14, %9, %cst_7 {dimension_numbers = #tpu.dot_dimension_numbers<[1], [0], [0], [1], [0, 0, 1, 1], [], []>} : vector<2x128xbf16>, vector<128x128xbf16>, vector<2x128xf32> -> vector<2x128xf32>
    %16 = arith.addf %13, %15 : vector<2x128xf32>
    %17 = math.tanh %16 : vector<2x128xf32>
    %18 = arith.addf %11, %17 : vector<2x128xf32>
    %19 = vector.extract_strided_slice %8 {offsets = [0, 1, 0], sizes = [2, 1, 128], strides = [1, 1, 1]} : vector<2x8x128xf32> to vector<2x1x128xf32>
    %20 = vector.shape_cast %19 : vector<2x1x128xf32> to vector<2x128xf32>
    %21 = arith.truncf %17 : vector<2x128xf32> to vector<2x128xbf16>
    %cst_8 = arith.constant dense<0.000000e+00> : vector<2x128xf32>
    %22 = tpu.matmul %21, %9, %cst_8 {dimension_numbers = #tpu.dot_dimension_numbers<[1], [0], [0], [1], [0, 0, 1, 1], [], []>} : vector<2x128xbf16>, vector<128x128xbf16>, vector<2x128xf32> -> vector<2x128xf32>
    %23 = arith.addf %20, %22 : vector<2x128xf32>
    %24 = math.tanh %23 : vector<2x128xf32>
    %25 = arith.addf %18, %24 : vector<2x128xf32>
    %26 = vector.extract_strided_slice %8 {offsets = [0, 2, 0], sizes = [2, 1, 128], strides = [1, 1, 1]} : vector<2x8x128xf32> to vector<2x1x128xf32>
    %27 = vector.shape_cast %26 : vector<2x1x128xf32> to vector<2x128xf32>
    %28 = arith.truncf %24 : vector<2x128xf32> to vector<2x128xbf16>
    %cst_9 = arith.constant dense<0.000000e+00> : vector<2x128xf32>
    %29 = tpu.matmul %28, %9, %cst_9 {dimension_numbers = #tpu.dot_dimension_numbers<[1], [0], [0], [1], [0, 0, 1, 1], [], []>} : vector<2x128xbf16>, vector<128x128xbf16>, vector<2x128xf32> -> vector<2x128xf32>
    %30 = arith.addf %27, %29 : vector<2x128xf32>
    %31 = math.tanh %30 : vector<2x128xf32>
    %32 = arith.addf %25, %31 : vector<2x128xf32>
    %33 = vector.extract_strided_slice %8 {offsets = [0, 3, 0], sizes = [2, 1, 128], strides = [1, 1, 1]} : vector<2x8x128xf32> to vector<2x1x128xf32>
    %34 = vector.shape_cast %33 : vector<2x1x128xf32> to vector<2x128xf32>
    %35 = arith.truncf %31 : vector<2x128xf32> to vector<2x128xbf16>
    %cst_10 = arith.constant dense<0.000000e+00> : vector<2x128xf32>
    %36 = tpu.matmul %35, %9, %cst_10 {dimension_numbers = #tpu.dot_dimension_numbers<[1], [0], [0], [1], [0, 0, 1, 1], [], []>} : vector<2x128xbf16>, vector<128x128xbf16>, vector<2x128xf32> -> vector<2x128xf32>
    %37 = arith.addf %34, %36 : vector<2x128xf32>
    %38 = math.tanh %37 : vector<2x128xf32>
    %39 = arith.addf %32, %38 : vector<2x128xf32>
    %40 = vector.extract_strided_slice %8 {offsets = [0, 4, 0], sizes = [2, 1, 128], strides = [1, 1, 1]} : vector<2x8x128xf32> to vector<2x1x128xf32>
    %41 = vector.shape_cast %40 : vector<2x1x128xf32> to vector<2x128xf32>
    %42 = arith.truncf %38 : vector<2x128xf32> to vector<2x128xbf16>
    %cst_11 = arith.constant dense<0.000000e+00> : vector<2x128xf32>
    %43 = tpu.matmul %42, %9, %cst_11 {dimension_numbers = #tpu.dot_dimension_numbers<[1], [0], [0], [1], [0, 0, 1, 1], [], []>} : vector<2x128xbf16>, vector<128x128xbf16>, vector<2x128xf32> -> vector<2x128xf32>
    %44 = arith.addf %41, %43 : vector<2x128xf32>
    %45 = math.tanh %44 : vector<2x128xf32>
    %46 = arith.addf %39, %45 : vector<2x128xf32>
    %47 = vector.extract_strided_slice %8 {offsets = [0, 5, 0], sizes = [2, 1, 128], strides = [1, 1, 1]} : vector<2x8x128xf32> to vector<2x1x128xf32>
    %48 = vector.shape_cast %47 : vector<2x1x128xf32> to vector<2x128xf32>
    %49 = arith.truncf %45 : vector<2x128xf32> to vector<2x128xbf16>
    %cst_12 = arith.constant dense<0.000000e+00> : vector<2x128xf32>
    %50 = tpu.matmul %49, %9, %cst_12 {dimension_numbers = #tpu.dot_dimension_numbers<[1], [0], [0], [1], [0, 0, 1, 1], [], []>} : vector<2x128xbf16>, vector<128x128xbf16>, vector<2x128xf32> -> vector<2x128xf32>
    %51 = arith.addf %48, %50 : vector<2x128xf32>
    %52 = math.tanh %51 : vector<2x128xf32>
    %53 = arith.addf %46, %52 : vector<2x128xf32>
    %54 = vector.extract_strided_slice %8 {offsets = [0, 6, 0], sizes = [2, 1, 128], strides = [1, 1, 1]} : vector<2x8x128xf32> to vector<2x1x128xf32>
    %55 = vector.shape_cast %54 : vector<2x1x128xf32> to vector<2x128xf32>
    %56 = arith.truncf %52 : vector<2x128xf32> to vector<2x128xbf16>
    %cst_13 = arith.constant dense<0.000000e+00> : vector<2x128xf32>
    %57 = tpu.matmul %56, %9, %cst_13 {dimension_numbers = #tpu.dot_dimension_numbers<[1], [0], [0], [1], [0, 0, 1, 1], [], []>} : vector<2x128xbf16>, vector<128x128xbf16>, vector<2x128xf32> -> vector<2x128xf32>
    %58 = arith.addf %55, %57 : vector<2x128xf32>
    %59 = math.tanh %58 : vector<2x128xf32>
    %60 = arith.addf %53, %59 : vector<2x128xf32>
    %61 = vector.extract_strided_slice %8 {offsets = [0, 7, 0], sizes = [2, 1, 128], strides = [1, 1, 1]} : vector<2x8x128xf32> to vector<2x1x128xf32>
    %62 = vector.shape_cast %61 : vector<2x1x128xf32> to vector<2x128xf32>
    %63 = arith.truncf %59 : vector<2x128xf32> to vector<2x128xbf16>
    %cst_14 = arith.constant dense<0.000000e+00> : vector<2x128xf32>
    %64 = tpu.matmul %63, %9, %cst_14 {dimension_numbers = #tpu.dot_dimension_numbers<[1], [0], [0], [1], [0, 0, 1, 1], [], []>} : vector<2x128xbf16>, vector<128x128xbf16>, vector<2x128xf32> -> vector<2x128xf32>
    %65 = arith.addf %62, %64 : vector<2x128xf32>
    %66 = math.tanh %65 : vector<2x128xf32>
    %67 = arith.addf %60, %66 : vector<2x128xf32>
    %c0_15 = arith.constant 0 : index
    %c0_16 = arith.constant 0 : index
    %68 = vector.load %arg3[%c0_15, %c0_16] : memref<128x8xf32, #tpu.memory_space<vmem>>, vector<128x8xf32>
    %cst_17 = arith.constant dense<0.000000e+00> : vector<2x8xf32>
    %69 = tpu.matmul %67, %68, %cst_17 {dimension_numbers = #tpu.dot_dimension_numbers<[1], [0], [0], [1], [0, 0, 1, 1], [], []>} : vector<2x128xf32>, vector<128x8xf32>, vector<2x8xf32> -> vector<2x8xf32>
    %c0_18 = arith.constant 0 : index
    %c0_19 = arith.constant 0 : index
    %70 = vector.load %arg4[%c0_18, %c0_19] : memref<1x8xf32, #tpu.memory_space<vmem>>, vector<1x8xf32>
    %71 = vector.broadcast %70 : vector<1x8xf32> to vector<2x8xf32>
    %72 = arith.addf %69, %71 : vector<2x8xf32>
    %c0_20 = arith.constant 0 : index
    %c0_21 = arith.constant 0 : index
    %73 = vector.load %arg5[%c0_20, %c0_21] : memref<2x8xf32, #tpu.memory_space<vmem>>, vector<2x8xf32>
    tpu.vector_store %arg5[%c0_20, %c0_21], %72 {strides = array<i32>} : memref<2x8xf32, #tpu.memory_space<vmem>>, vector<2x8xf32>,
    %cst_22 = arith.constant dense<0xFF800000> : vector<2xf32>
    %74 = vector.multi_reduction <maximumf>, %72, %cst_22 [1] : vector<2x8xf32> to vector<2xf32>
    %75 = vector.shape_cast %74 : vector<2xf32> to vector<2x1xf32>
    %76 = tpu.iota {dimensions = array<i32: 1>} : vector<2x8xi32>
    %77 = arith.sitofp %76 : vector<2x8xi32> to vector<2x8xf32>
    %78 = vector.broadcast %75 : vector<2x1xf32> to vector<2x8xf32>
    %79 = arith.cmpf oeq, %72, %78 : vector<2x8xf32>
    %cst_23 = arith.constant 8.000000e+00 : f32
    %80 = vector.broadcast %cst_23 : f32 to vector<2x8xf32>
    %81 = arith.select %79, %77, %80 : vector<2x8xi1>, vector<2x8xf32>
    %cst_24 = arith.constant dense<0x7F800000> : vector<2xf32>
    %82 = vector.multi_reduction <minimumf>, %81, %cst_24 [1] : vector<2x8xf32> to vector<2xf32>
    %83 = vector.shape_cast %82 : vector<2xf32> to vector<2x1xf32>
    %84 = arith.fptosi %83 : vector<2x1xf32> to vector<2x1xi32>
    %c0_25 = arith.constant 0 : index
    %c0_26 = arith.constant 0 : index
    %85 = vector.load %arg6[%c0_25, %c0_26] : memref<2x1xi32, #tpu.memory_space<vmem>>, vector<2x1xi32>
    tpu.vector_store %arg6[%c0_25, %c0_26], %84 {strides = array<i32>} : memref<2x1xi32, #tpu.memory_space<vmem>>, vector<2x1xi32>,
    return
  }
}

</mosaic_0001>

<bundles_post_ra>
// kernel: _forward_jit.1
= control target key start
LH: loop header
LB: loop body
LE: loop exit
PB: predicated region body
PF: predicated region fallthrough
CT: control target
= control target key end

     0   :  { %12 = vsyncpa [#allocation3], 0  ;;  %s948_s0 = inlined_call_operand.vmem [shape: s32[16,1], index: 0, kind: input, shape index: {}]   ;;  %s949_s1 = inlined_call_operand.vmem [shape: f32[128,128], index: 1, kind: input, shape index: {}]   ;;  %s950_s2 = inlined_call_operand.hbm [shape: bf16[128,128], index: 2, kind: input, shape index: {}]   ;;  %s951_s3 = inlined_call_operand.vmem [shape: f32[128,8], index: 3, kind: input, shape index: {}]   ;;  %s952_s4 = inlined_call_operand.vmem [shape: f32[1,8], index: 4, kind: input, shape index: {}]   ;;  %s953_s5 = inlined_call_operand.hbm [shape: f32[2,8], index: 5, kind: output, shape index: {0}]   ;;  %s954_s6 = inlined_call_operand.vmem [shape: s32[2,1], index: 6, kind: output, shape index: {1}]  }
   0x1   :  { %13 = vsyncpa [#allocation4], 0  ;;  %s22_s23 = sshll.u32 %s950_s2, 4  ;;  %s688_s24 = smov [#allocation2]   ;;  %s23_s23 = int_to_ptr.hbm [resolvable:$true] %s22_s23 }
   0x2   :  { %s24_s25 = sshll.u32 %s688_s24, 4  ;;  %s689_s26 = smov 64   ;;  %s25_s25 = int_to_ptr.vmem [resolvable:$true] %s24_s25 }
   0x3   :  { %s690_s27 = smov 4  }
   0x4   :  { %30 = dma.hbm_to_vmem [thread:$0]  %s23_s23, 1024, %s25_s25, [#allocation3], %s689_s26, %s689_s26, %s690_s27  }
   0x5   :  { %684 = dma.done.wait [#allocation3], 1024  }
   0x6   :  { %685 = vsyncadd [#allocation3], 4294966272  ;;  %v691_v0 = vmov 0   ;;  %v40_v1 = vld [vmem:[%s948_s0] sm:$0xff]  ;;  %v736_v2 = vld [vmem:[#allocation2 + $0x38] sm:$0xff]  ;;  %v42_v27 = vlaneseq  ;;  %v692_v30 = vmov 1.0  }
   0x7   :  { %602 = vset.pattern.permute.xlu0 %v691_v0  ;;  %v71_v3 = vld [vmem:[%s949_s1 + $0x78] sm:$0xff]  ;;  %v70_v4 = vld [vmem:[%s949_s1 + $0x70] sm:$0xff]  ;;  %159 = vmatpush.bf16.msra.mxu1 %v736_v2  ;;  %v69_v6 = vld [vmem:[%s949_s1 + $0x68] sm:$0xff]  ;;  %vm189_vm2 = vcmask 1041409   ;;  %vm512_vm3 = vcmask 58368   ;;  %s693_s18 = smov [#allocation5]  }
   0x8   :  { %45 = vperm.xlu0 %602, %v40_v1   ;;  %72 = vmatpush.msra.mxu0 %v71_v3  ;;  %v745_v5 = vld [vmem:[#allocation2 + $0x30] sm:$0xff]  ;;  %v68_v7 = vld [vmem:[%s949_s1 + $0x60] sm:$0xff]  ;;  %v41_v8 = vld [vmem:[%s948_s0 + $0x8] sm:$0xff]  ;;  %v851_v28 = vand.u32 127, %v42_v27  ;;  %s531_s0 = sshll.u32 %s693_s18, 4  ;;  %s533_s21 = sshll.u32 %s953_s5, 4  ;;  %s532_s0 = int_to_ptr.vmem [resolvable:$true] %s531_s0  ;;  %s534_s21 = int_to_ptr.hbm [resolvable:$true] %s533_s21 }
   0x9   :  { %193 = vmatpush.bf16.msra.mxu2 %v736_v2  ;;  %232 = vmatpush.bf16.msra.mxu3 %v736_v2  ;;  %v759_v9 = vld [vmem:[#allocation2 + $0x28] sm:$0xff]  ;;  %v67_v10 = vld [vmem:[%s949_s1 + $0x58] sm:$0xff]  ;;  %v66_v11 = vld [vmem:[%s949_s1 + $0x50] sm:$0xff]  ;;  %vm524_vm6 = vcmask 1024  }
   0xa   :  { %73 = vmatpush.msra.mxu0 %v70_v4  ;;  %v770_v12 = vld [vmem:[#allocation2 + $0x20] sm:$0xff]  ;;  %v65_v13 = vld [vmem:[%s949_s1 + $0x48] sm:$0xff]  ;;  %v781_v15 = vld [vmem:[#allocation2 + $0x18] sm:$0xff] }
   0xb   :  { %160 = vmatpush.bf16.msra.mxu1 %v745_v5  ;;  %v64_v14 = vld [vmem:[%s949_s1 + $0x40] sm:$0xff]  ;;  %v63_v16 = vld [vmem:[%s949_s1 + $0x38] sm:$0xff]  ;;  %v62_v17 = vld [vmem:[%s949_s1 + $0x30] sm:$0xff] }
   0xc   :  { %74 = vmatpush.msra.mxu0 %v69_v6  ;;  %v792_v18 = vld [vmem:[#allocation2 + $0x10] sm:$0xff]  ;;  %v61_v19 = vld [vmem:[%s949_s1 + $0x28] sm:$0xff]  ;;  %v60_v20 = vld [vmem:[%s949_s1 + $0x20] sm:$0xff] }
   0xd   :  { %194 = vmatpush.bf16.msra.mxu2 %v745_v5  ;;  %233 = vmatpush.bf16.msra.mxu3 %v745_v5  ;;  %v803_v21 = vld [vmem:[#allocation2 + $0x8] sm:$0xff]  ;;  %v59_v22 = vld [vmem:[%s949_s1 + $0x18] sm:$0xff]  ;;  %v58_v23 = vld [vmem:[%s949_s1 + $0x10] sm:$0xff] }
   0xe   :  { %75 = vmatpush.msra.mxu0 %v68_v7  ;;  %v583_v24 = vld [vmem:[#allocation2] sm:$0xff]  ;;  %v57_v25 = vld [vmem:[%s949_s1 + $0x8] sm:$0xff] }
   0xf   :  { %161 = vmatpush.bf16.msra.mxu1 %v759_v9  ;;  %v56_v26 = vld [vmem:[%s949_s1] sm:$0xff] }
  0x10   :  { %48 = vperm.xlu0 %602, %v41_v8   ;;  %76 = vmatpush.msra.mxu0 %v67_v10 }
  0x11   :  { %195 = vmatpush.bf16.msra.mxu2 %v759_v9  ;;  %234 = vmatpush.bf16.msra.mxu3 %v759_v9 }
  0x12   :  { %77 = vmatpush.msra.mxu0 %v66_v11 }
  0x13   :  { %162 = vmatpush.bf16.msra.mxu1 %v770_v12 }
  0x14   :  { %78 = vmatpush.msra.mxu0 %v65_v13 }
  0x15   :  { %196 = vmatpush.bf16.msra.mxu2 %v770_v12  ;;  %235 = vmatpush.bf16.msra.mxu3 %v770_v12 }
  0x16   :  { %79 = vmatpush.msra.mxu0 %v64_v14 }
  0x17   :  { %163 = vmatpush.bf16.msra.mxu1 %v781_v15 }
  0x18   :  { %80 = vmatpush.msra.mxu0 %v63_v16 }
  0x19   :  { %197 = vmatpush.bf16.msra.mxu2 %v781_v15  ;;  %236 = vmatpush.bf16.msra.mxu3 %v781_v15 }
  0x1a   :  { %81 = vmatpush.msra.mxu0 %v62_v17 }
  0x1b   :  { %164 = vmatpush.bf16.msra.mxu1 %v792_v18 }
  0x1c   :  { %82 = vmatpush.msra.mxu0 %v61_v19 }
  0x1d   :  { %198 = vmatpush.bf16.msra.mxu2 %v792_v18  ;;  %237 = vmatpush.bf16.msra.mxu3 %v792_v18 }
  0x1e   :  { %83 = vmatpush.msra.mxu0 %v60_v20 }
  0x1f   :  { %165 = vmatpush.bf16.msra.mxu1 %v803_v21 }
  0x20   :  { %84 = vmatpush.msra.mxu0 %v59_v22 }
  0x21   :  { %199 = vmatpush.bf16.msra.mxu2 %v803_v21  ;;  %238 = vmatpush.bf16.msra.mxu3 %v803_v21 }
  0x22   :  { %85 = vmatpush.msra.mxu0 %v58_v23 }
  0x23   :  { %166 = vmatpush.bf16.msra.mxu1 %v583_v24 }
  0x24   :  { %86 = vmatpush.msra.mxu0 %v57_v25 }
  0x25   :  { %200 = vmatpush.bf16.msra.mxu2 %v583_v24  ;;  %239 = vmatpush.bf16.msra.mxu3 %v583_v24 }
  0x26   :  { %167 = vmatmul.bf16.vlgmr.msra.gmra.mxu1 %v691_v0  ;;  %87 = vmatpush.msra.mxu0 %v56_v26 }
  0x27   :  { %314 = vmatpush.bf16.msrb.mxu1 %v736_v2 }
  0x28   :  { %273 = vmatpush.bf16.msrb.mxu0 %v736_v2 }
  0x29   :  { %355 = vmatpush.bf16.msrb.mxu2 %v736_v2  ;;  %396 = vmatpush.bf16.msrb.mxu3 %v736_v2 }
  0x2b   :  { %315 = vmatpush.bf16.msrb.mxu1 %v745_v5 }
  0x2c   :  { %274 = vmatpush.bf16.msrb.mxu0 %v745_v5 }
  0x2d   :  { %356 = vmatpush.bf16.msrb.mxu2 %v745_v5  ;;  %397 = vmatpush.bf16.msrb.mxu3 %v745_v5 }
  0x2f   :  { %316 = vmatpush.bf16.msrb.mxu1 %v759_v9 }
  0x30   :  { %275 = vmatpush.bf16.msrb.mxu0 %v759_v9 }
  0x31   :  { %357 = vmatpush.bf16.msrb.mxu2 %v759_v9  ;;  %398 = vmatpush.bf16.msrb.mxu3 %v759_v9 }
  0x33   :  { %317 = vmatpush.bf16.msrb.mxu1 %v770_v12 }
  0x34   :  { %276 = vmatpush.bf16.msrb.mxu0 %v770_v12 }
  0x35   :  { %358 = vmatpush.bf16.msrb.mxu2 %v770_v12  ;;  %399 = vmatpush.bf16.msrb.mxu3 %v770_v12 }
  0x37   :  { %318 = vmatpush.bf16.msrb.mxu1 %v781_v15 }
  0x38   :  { %277 = vmatpush.bf16.msrb.mxu0 %v781_v15 }
  0x39   :  { %359 = vmatpush.bf16.msrb.mxu2 %v781_v15  ;;  %400 = vmatpush.bf16.msrb.mxu3 %v781_v15 }
  0x3b   :  { %319 = vmatpush.bf16.msrb.mxu1 %v792_v18 }
  0x3c   :  { %278 = vmatpush.bf16.msrb.mxu0 %v792_v18 }
  0x3d   :  { %360 = vmatpush.bf16.msrb.mxu2 %v792_v18  ;;  %401 = vmatpush.bf16.msrb.mxu3 %v792_v18 }
  0x3f   :  { %320 = vmatpush.bf16.msrb.mxu1 %v803_v21 }
  0x40   :  { %279 = vmatpush.bf16.msrb.mxu0 %v803_v21 }
  0x41   :  { %361 = vmatpush.bf16.msrb.mxu2 %v803_v21  ;;  %402 = vmatpush.bf16.msrb.mxu3 %v803_v21 }
  0x43   :  { %321 = vmatpush.bf16.msrb.mxu1 %v583_v24 }
  0x44   :  { %280 = vmatpush.bf16.msrb.mxu0 %v583_v24 }
  0x45   :  { %362 = vmatpush.bf16.msrb.mxu2 %v583_v24  ;;  %403 = vmatpush.bf16.msrb.mxu3 %v583_v24 }
  0x7a   :  { %v46_v29 = vpop.permute.xlu0 %45 }
  0x7b   :  { %vm50_vm0 = vcmp.eq.s32.totalorder %v851_v28, %v46_v29 }
  0x7c   :  { %549 = vmatmul.msk.f32.vlgmr.msra.gmra.mxu0 %vm50_vm0, %v692_v30 }
  0x7d   :  { %437 = vmatpush.bf16.msra.mxu0 %v736_v2 }
  0x81   :  { %438 = vmatpush.bf16.msra.mxu0 %v745_v5 }
  0x82   :  { %v49_v31 = vpop.permute.xlu0 %48 }
  0x83   :  { %vm51_vm1 = vcmp.eq.s32.totalorder %v851_v28, %v49_v31 }
  0x84   :  { %550 = vmatmul.msk.f32.gmra.mxu0 %vm51_vm1, %v692_v30 }
  0x85   :  { %439 = vmatpush.bf16.msra.mxu0 %v759_v9 }
  0x89   :  { %440 = vmatpush.bf16.msra.mxu0 %v770_v12 }
  0x8d   :  { %441 = vmatpush.bf16.msra.mxu0 %v781_v15 }
  0x91   :  { %442 = vmatpush.bf16.msra.mxu0 %v792_v18 }
  0x95   :  { %443 = vmatpush.bf16.msra.mxu0 %v803_v21 }
  0x99   :  { %444 = vmatpush.bf16.msra.mxu0 %v583_v24 }
  0xa3   :  { %v168_v32 = vpop.f32.mrf.mxu1 }
  0xa4   :  { %v173_v35 = vrot.slane %v168_v32, 1 }
  0xab   :  { %v170_v33 = vpop.f32.mrf.mxu1 }
  0xf9   :  { %v862_v34 = vpop.f32.mrf.mxu0 }
  0xfa   :  { %v176_v36 = vadd.f32 %v168_v32, %v862_v34 }
  0xfc   :  { %604 = vtanh.f32 %v176_v36 }
 0x101   :  { %v865_v37 = vpop.f32.mrf.mxu0 }
 0x102   :  { %v177_v38 = vadd.f32 %v173_v35, %v865_v37  ;;  %v605_v39 = vpop.eup %604 }
 0x103   :  { %v182_v41 = vpack.c.bf16 %v605_v39, %v605_v39 }
 0x104   :  { %606 = vtanh.f32 %v177_v38 }
 0x105   :  { %v186_v44 = vunpack.c.l.b16 %v182_v41 }
 0x10a   :  { %v607_v40 = vpop.eup %606 }
 0x10b   :  { %v183_v42 = vpack.c.bf16 %v607_v40, %v607_v40 }
 0x10d   :  { %v187_v43 = vunpack.c.l.b16 %v183_v42 }
 0x10f   :  { %v188_v45 = vrot.slane %v187_v43, 7 }
 0x111   :  { %v190_v46 = vsel %vm189_vm2, %v188_v45, %v186_v44 }
 0x112   :  { %v191_v47 = vpack.c.b16 %v190_v46, %v190_v46 }
 0x114   :  { %201 = vmatmul.bf16.vlgmr.msra.gmra.mxu2 %v191_v47 }
 0x197   :  { %v202_v48 = vpop.f32.mrf.mxu2 }
 0x198   :  { %v207_v49 = vrot.slane %v202_v48, 7  ;;  %v211_v50 = vadd.f32 %v202_v48, %v865_v37 }
 0x19a   :  { %v210_v51 = vadd.f32 %v207_v49, %v862_v34  ;;  %608 = vtanh.f32 %v211_v50 }
 0x19c   :  { %610 = vtanh.f32 %v210_v51 }
 0x19f   :  { %v204_v52 = vpop.f32.mrf.mxu2 }
 0x1a0   :  { %v609_v53 = vpop.eup %608 }
 0x1a1   :  { %v223_v56 = vpack.c.bf16 %v609_v53, %v609_v53  ;;  %v217_v5 = vrot.slane %v609_v53, 1 }
 0x1a2   :  { %v611_v54 = vpop.eup %610 }
 0x1a3   :  { %v222_v55 = vpack.c.bf16 %v611_v54, %v611_v54  ;;  %v227_v58 = vunpack.c.l.b16 %v223_v56  ;;  %v216_v3 = vrot.slane %v611_v54, 1  ;;  %v221_v11 = vadd.f32 %v607_v40, %v217_v5 }
 0x1a5   :  { %v226_v57 = vunpack.c.l.b16 %v222_v55  ;;  %v220_v8 = vadd.f32 %v605_v39, %v216_v3 }
 0x1a7   :  { %v228_v59 = vrot.slane %v226_v57, 1 }
 0x1a9   :  { %v229_v60 = vsel %vm189_vm2, %v227_v58, %v228_v59 }
 0x1aa   :  { %v230_v61 = vpack.c.b16 %v229_v60, %v229_v60 }
 0x1ac   :  { %240 = vmatmul.bf16.vlgmr.msra.gmra.mxu3 %v230_v61 }
 0x22f   :  { %v241_v62 = vpop.f32.mrf.mxu3 }
 0x230   :  { %v246_v63 = vrot.slane %v241_v62, 6  ;;  %v247_v0 = vrot.slane %v241_v62, 7 }
 0x232   :  { %v250_v1 = vadd.f32 %v246_v63, %v862_v34  ;;  %v251_v2 = vadd.f32 %v247_v0, %v865_v37 }
 0x234   :  { %612 = vtanh.f32 %v250_v1 }
 0x235   :  { %614 = vtanh.f32 %v251_v2 }
 0x237   :  { %v243_v4 = vpop.f32.mrf.mxu3 }
 0x23a   :  { %v613_v6 = vpop.eup %612 }
 0x23b   :  { %v615_v7 = vpop.eup %614  ;;  %v256_v9 = vrot.slane %v613_v6, 2  ;;  %v262_v10 = vpack.c.bf16 %v613_v6, %v613_v6 }
 0x23c   :  { %v257_v12 = vrot.slane %v615_v7, 2  ;;  %v263_v13 = vpack.c.bf16 %v615_v7, %v615_v7 }
 0x23d   :  { %v260_v14 = vadd.f32 %v256_v9, %v220_v8  ;;  %v266_v15 = vunpack.c.l.b16 %v262_v10 }
 0x23e   :  { %v261_v16 = vadd.f32 %v257_v12, %v221_v11  ;;  %v267_v17 = vunpack.c.l.b16 %v263_v13 }
 0x23f   :  { %v268_v18 = vrot.slane %v266_v15, 2 }
 0x240   :  { %v269_v19 = vrot.slane %v267_v17, 1 }
 0x242   :  { %v270_v20 = vsel %vm189_vm2, %v269_v19, %v268_v18 }
 0x243   :  { %v271_v21 = vpack.c.b16 %v270_v20, %v270_v20 }
 0x245   :  { %281 = vmatmul.bf16.vlgmr.msrb.gmra.mxu0 %v271_v21  ;;  %v482_v21 = vld [vmem:[%s951_s3 + $0x78] sm:$0xff] }
 0x246   :  { %492 = vmatpush.msra.mxu1 %v482_v21 }
 0x2c2   :  { %v282_v22 = vpop.f32.mrf.mxu0 }
 0x2c3   :  { %v287_v23 = vrot.slane %v282_v22, 5  ;;  %v288_v24 = vrot.slane %v282_v22, 6  ;;  %v481_v22 = vld [vmem:[%s951_s3 + $0x70] sm:$0xff] }
 0x2c4   :  { %493 = vmatpush.msra.mxu1 %v481_v22 }
 0x2c5   :  { %v291_v25 = vadd.f32 %v287_v23, %v862_v34  ;;  %v292_v26 = vadd.f32 %v288_v24, %v865_v37  ;;  %v480_v23 = vld [vmem:[%s951_s3 + $0x68] sm:$0xff]  ;;  %v479_v24 = vld [vmem:[%s951_s3 + $0x60] sm:$0xff] }
 0x2c6   :  { %494 = vmatpush.msra.mxu1 %v480_v23 }
 0x2c7   :  { %616 = vtanh.f32 %v291_v25  ;;  %v478_v25 = vld [vmem:[%s951_s3 + $0x58] sm:$0xff] }
 0x2c8   :  { %618 = vtanh.f32 %v292_v26  ;;  %495 = vmatpush.msra.mxu1 %v479_v24  ;;  %v477_v26 = vld [vmem:[%s951_s3 + $0x50] sm:$0xff] }
 0x2ca   :  { %v284_v27 = vpop.f32.mrf.mxu0  ;;  %496 = vmatpush.msra.mxu1 %v478_v25 }
 0x2cc   :  { %497 = vmatpush.msra.mxu1 %v477_v26 }
 0x2cd   :  { %v617_v29 = vpop.eup %616 }
 0x2ce   :  { %v619_v30 = vpop.eup %618  ;;  %v297_v31 = vrot.slane %v617_v29, 3  ;;  %v303_v32 = vpack.c.bf16 %v617_v29, %v617_v29 }
 0x2cf   :  { %v298_v33 = vrot.slane %v619_v30, 3  ;;  %v304_v35 = vpack.c.bf16 %v619_v30, %v619_v30 }
 0x2d0   :  { %v301_v36 = vadd.f32 %v297_v31, %v260_v14  ;;  %v307_v38 = vunpack.c.l.b16 %v303_v32 }
 0x2d1   :  { %v302_v39 = vadd.f32 %v298_v33, %v261_v16  ;;  %v308_v40 = vunpack.c.l.b16 %v304_v35 }
 0x2d2   :  { %v309_v41 = vrot.slane %v307_v38, 3 }
 0x2d3   :  { %v310_v42 = vrot.slane %v308_v40, 2 }
 0x2d5   :  { %v311_v43 = vsel %vm189_vm2, %v310_v42, %v309_v41 }
 0x2d6   :  { %v312_v44 = vpack.c.b16 %v311_v43, %v311_v43 }
 0x2d8   :  { %322 = vmatmul.bf16.vlgmr.msrb.gmra.mxu1 %v312_v44 }
 0x355   :  { %v323_v45 = vpop.f32.mrf.mxu1 }
 0x356   :  { %v328_v46 = vrot.slane %v323_v45, 4  ;;  %v329_v47 = vrot.slane %v323_v45, 5 }
 0x358   :  { %v332_v48 = vadd.f32 %v328_v46, %v862_v34  ;;  %v333_v49 = vadd.f32 %v329_v47, %v865_v37 }
 0x35a   :  { %620 = vtanh.f32 %v332_v48 }
 0x35b   :  { %622 = vtanh.f32 %v333_v49 }
 0x35d   :  { %v325_v50 = vpop.f32.mrf.mxu1 }
 0x35e   :  { %v476_v50 = vld [vmem:[%s951_s3 + $0x48] sm:$0xff] }
 0x35f   :  { %498 = vmatpush.msra.mxu1 %v476_v50 }
 0x360   :  { %v621_v51 = vpop.eup %620 }
 0x361   :  { %v623_v52 = vpop.eup %622  ;;  %v338_v53 = vrot.slane %v621_v51, 4  ;;  %v344_v54 = vpack.c.bf16 %v621_v51, %v621_v51  ;;  %v475_v51 = vld [vmem:[%s951_s3 + $0x40] sm:$0xff] }
 0x362   :  { %v339_v55 = vrot.slane %v623_v52, 4  ;;  %v345_v56 = vpack.c.bf16 %v623_v52, %v623_v52  ;;  %499 = vmatpush.msra.mxu1 %v475_v51  ;;  %v474_v52 = vld [vmem:[%s951_s3 + $0x38] sm:$0xff] }
 0x363   :  { %v342_v57 = vadd.f32 %v338_v53, %v301_v36  ;;  %v348_v58 = vunpack.c.l.b16 %v344_v54  ;;  %v473_v53 = vld [vmem:[%s951_s3 + $0x30] sm:$0xff]  ;;  %v472_v54 = vld [vmem:[%s951_s3 + $0x28] sm:$0xff] }
 0x364   :  { %v343_v59 = vadd.f32 %v339_v55, %v302_v39  ;;  %v349_v60 = vunpack.c.l.b16 %v345_v56  ;;  %500 = vmatpush.msra.mxu1 %v474_v52  ;;  %v471_v55 = vld [vmem:[%s951_s3 + $0x20] sm:$0xff]  ;;  %v470_v56 = vld [vmem:[%s951_s3 + $0x18] sm:$0xff] }
 0x365   :  { %v350_v61 = vrot.slane %v348_v58, 4  ;;  %v468_v58 = vld [vmem:[%s951_s3 + $0x8] sm:$0xff] }
 0x366   :  { %v351_v62 = vrot.slane %v349_v60, 3  ;;  %501 = vmatpush.msra.mxu1 %v473_v53 }
 0x368   :  { %v352_v63 = vsel %vm189_vm2, %v351_v62, %v350_v61  ;;  %502 = vmatpush.msra.mxu1 %v472_v54 }
 0x369   :  { %v353_v0 = vpack.c.b16 %v352_v63, %v352_v63 }
 0x36a   :  { %503 = vmatpush.msra.mxu1 %v471_v55 }
 0x36b   :  { %363 = vmatmul.bf16.vlgmr.msrb.gmra.mxu2 %v353_v0 }
 0x36c   :  { %504 = vmatpush.msra.mxu1 %v470_v56 }
 0x3ee   :  { %v364_v1 = vpop.f32.mrf.mxu2 }
 0x3ef   :  { %v369_v2 = vrot.slane %v364_v1, 3  ;;  %v370_v3 = vrot.slane %v364_v1, 4 }
 0x3f1   :  { %v373_v4 = vadd.f32 %v369_v2, %v862_v34  ;;  %v374_v5 = vadd.f32 %v370_v3, %v865_v37 }
 0x3f3   :  { %624 = vtanh.f32 %v373_v4 }
 0x3f4   :  { %626 = vtanh.f32 %v374_v5 }
 0x3f6   :  { %v366_v6 = vpop.f32.mrf.mxu2 }
 0x3f9   :  { %v625_v7 = vpop.eup %624 }
 0x3fa   :  { %v627_v8 = vpop.eup %626  ;;  %v379_v9 = vrot.slane %v625_v7, 5  ;;  %v385_v10 = vpack.c.bf16 %v625_v7, %v625_v7 }
 0x3fb   :  { %v380_v11 = vrot.slane %v627_v8, 5  ;;  %v386_v12 = vpack.c.bf16 %v627_v8, %v627_v8 }
 0x3fc   :  { %v389_v13 = vunpack.c.l.b16 %v385_v10  ;;  %v383_v14 = vadd.f32 %v379_v9, %v342_v57  ;;  %v469_v57 = vld [vmem:[%s951_s3 + $0x10] sm:$0xff]  ;;  %v603_v10 = vld [vmem:[%s952_s4] ss:$0 sm:$0xff] }
 0x3fd   :  { %v390_v15 = vunpack.c.l.b16 %v386_v12  ;;  %v384_v16 = vadd.f32 %v380_v11, %v343_v59  ;;  %505 = vmatpush.msra.mxu1 %v469_v57  ;;  %v467_v59 = vld [vmem:[%s951_s3] sm:$0xff]  ;;  %v517_v12 = vcvt.s32.f32 %v851_v28 }
 0x3fe   :  { %v391_v17 = vrot.slane %v389_v13, 5 }
 0x3ff   :  { %v392_v18 = vrot.slane %v390_v15, 4  ;;  %506 = vmatpush.msra.mxu1 %v468_v58 }
 0x401   :  { %v393_v19 = vsel %vm189_vm2, %v392_v18, %v391_v17  ;;  %507 = vmatpush.msra.mxu1 %v467_v59 }
 0x402   :  { %v394_v20 = vpack.c.b16 %v393_v19, %v393_v19 }
 0x404   :  { %404 = vmatmul.bf16.vlgmr.msrb.gmra.mxu3 %v394_v20 }
 0x487   :  { %v405_v27 = vpop.f32.mrf.mxu3 }
 0x488   :  { %v410_v29 = vrot.slane %v405_v27, 2  ;;  %v411_v30 = vrot.slane %v405_v27, 3 }
 0x48a   :  { %v414_v31 = vadd.f32 %v410_v29, %v862_v34  ;;  %v415_v32 = vadd.f32 %v411_v30, %v865_v37 }
 0x48c   :  { %628 = vtanh.f32 %v414_v31 }
 0x48d   :  { %630 = vtanh.f32 %v415_v32 }
 0x48f   :  { %v407_v33 = vpop.f32.mrf.mxu3 }
 0x492   :  { %v629_v35 = vpop.eup %628 }
 0x493   :  { %v631_v36 = vpop.eup %630  ;;  %v420_v38 = vrot.slane %v629_v35, 6  ;;  %v426_v39 = vpack.c.bf16 %v629_v35, %v629_v35 }
 0x494   :  { %v421_v40 = vrot.slane %v631_v36, 6  ;;  %v427_v41 = vpack.c.bf16 %v631_v36, %v631_v36 }
 0x495   :  { %v430_v42 = vunpack.c.l.b16 %v426_v39  ;;  %v424_v43 = vadd.f32 %v420_v38, %v383_v14 }
 0x496   :  { %v431_v44 = vunpack.c.l.b16 %v427_v41  ;;  %v425_v45 = vadd.f32 %v421_v40, %v384_v16 }
 0x497   :  { %v432_v46 = vrot.slane %v430_v42, 6 }
 0x498   :  { %v433_v47 = vrot.slane %v431_v44, 5 }
 0x49a   :  { %v434_v48 = vsel %vm189_vm2, %v433_v47, %v432_v46 }
 0x49b   :  { %v435_v49 = vpack.c.b16 %v434_v48, %v434_v48 }
 0x49d   :  { %445 = vmatmul.bf16.vlgmr.msra.gmra.mxu0 %v435_v49 }
 0x51a   :  { %v446_v60 = vpop.f32.mrf.mxu0 }
 0x51b   :  { %v451_v61 = vrot.slane %v446_v60, 1  ;;  %v452_v62 = vrot.slane %v446_v60, 2 }
 0x51d   :  { %v455_v63 = vadd.f32 %v451_v61, %v862_v34  ;;  %v456_v0 = vadd.f32 %v452_v62, %v865_v37 }
 0x51f   :  { %632 = vtanh.f32 %v455_v63 }
 0x520   :  { %634 = vtanh.f32 %v456_v0 }
 0x522   :  { %v448_v1 = vpop.f32.mrf.mxu0 }
 0x525   :  { %v633_v2 = vpop.eup %632 }
 0x526   :  { %v635_v3 = vpop.eup %634  ;;  %v461_v4 = vrot.slane %v633_v2, 7 }
 0x527   :  { %v462_v5 = vrot.slane %v635_v3, 7 }
 0x528   :  { %v465_v7 = vadd.f32 %v461_v4, %v424_v43 }
 0x529   :  { %v466_v6 = vadd.f32 %v462_v5, %v425_v45 }
 0x52b   :  { %v489_v8 = vrot.slane %v466_v6, 7 }
 0x52d   :  { %v490_v9 = vsel %vm189_vm2, %v489_v8, %v465_v7 }
 0x52e   :  { %508 = vmatmul.f32.vlgmr.msra.gmra.mxu1 %v490_v9 }
 0x5ab   :  { %v509_v34 = vpop.f32.mrf.mxu1 }
 0x5ac   :  { %v510_v37 = vadd.f32 %v603_v10, %v509_v34 }
 0x5ae   :  { %v514_v11 = vsel %vm512_vm3, %v510_v37, -inf  ;;  %513 = vst.msk [vmem:[#allocation5] sm:$0x3] %vm512_vm3, %v510_v37 }
 0x5af   :  { %515 = vmax.xlane.f32.xlu1 %v514_v11  ;;  %536 = dma.vmem_to_hbm [thread:$0]  %s532_s0, 32, %s534_s21, [#allocation4]  }
 0x622   :  { %v516_v13 = vpop.xlane.xlu1 %515 }
 0x623   :  { %vm518_vm4 = vcmp.eq.f32.partialorder %v510_v37, %v516_v13 }
 0x624   :  { %v519_v14 = vsel %vm518_vm4, %v517_v12, 8.0 }
 0x625   :  { %v520_v15 = vsel %vm512_vm3, %v519_v14, inf }
 0x626   :  { %521 = vmin.xlane.f32.xlu1 %v520_v15 }
 0x699   :  { %v522_v16 = vpop.xlane.xlu1 %521 }
 0x69a   :  { %vm591_vm5 = vcmp.lt.s32.totalorder %v522_v16, 0  ;;  %v592_v17 = vceil.f32 %v522_v16  ;;  %v593_v18 = vfloor.f32 %v522_v16 }
 0x69c   :  { %v594_v19 = vsel %vm591_vm5, %v592_v17, %v593_v18 }
 0x69d   :  { %v595_v20 = vcvt.f32.s32 %v594_v19 }
 0x69f   :  { %525 = vst.msk [vmem:[%s954_s6] sm:$0x3] %vm524_vm6, %v595_v20 }
 0x6a0   :  { %686 = dma.done.wait [#allocation4], 32  }
 0x6a1   :  { %687 = vsyncadd [#allocation4], 4294967264 }
 0x6a2   :  { %545 = vsyncpa [#allocation3], 1 }
 0x6a3   :  { %546 = vsyncpa [#allocation4], 1 }

</bundles_post_ra>
